<compile_context>
chip_gen: v7x
topology: tpu7x:2x2x1
jax: 0.10.0
libtpu: 0.0.40
codegen_flags: <defaults>
</compile_context>

<pallas_src>
import functools

import jax
import jax.numpy as jnp
from jax import lax
from jax.experimental import pallas as pl
from jax.experimental.pallas import tpu as pltpu

_C1 = 0.01 ** 2
_C2 = 0.03 ** 2


def _round_up(x, m):
    return (x + m - 1) // m * m


def _loss_kernel(p_ref, t_ref, w_ref, rsel_ref, csel_ref, out_ref, *,
                 inv_hw, fake_slots):
    """One packed block: NB image-row-groups x LP lane-packed images, 2-D tile.

    p_ref/t_ref : (1, NB*H, LP*W)  predictions / targets (native dtype)
    w_ref       : (3, NB*H, LP*W)  [wx, wy, wi] pre-scaled mask maps (f32)
    rsel_ref    : (NB8, NB*H)      row -> image-row-group one-hot selector (f32)
    csel_ref    : (LP*W, LP8)      lane -> image-lane-chunk one-hot selector (f32)
    out_ref     : (1, 8, 128)      partials: [0,0,0]=depth+grad, [0,0,1]=ssim
    """
    p = p_ref[0].astype(jnp.float32)          # (R, C)
    t = t_ref[0].astype(jnp.float32)
    wx = w_ref[0]
    wy = w_ref[1]
    wi = w_ref[2]
    R, C = p.shape

    # ---- depth (L1) + gradient: one fused pre-scaled map, ONE reduction ----
    d = p - t
    dx = pltpu.roll(d, C - 1, axis=1) - d     # d[:, j+1] - d[:, j]  (masked by wx)
    dy = pltpu.roll(d, R - 1, axis=0) - d     # d[i+1, :] - d[i, :]  (masked by wy)
    dg_map = jnp.abs(d) * inv_hw + jnp.abs(dx) * wx + jnp.abs(dy) * wy
    dg_part = jnp.sum(dg_map)

    # ---- SSIM (3x3 uniform window, 'valid'): separable window sums -------
    def win9(x):                               # 4 rolls per map (was 8)
        cs = x + pltpu.roll(x, 1, axis=1) + pltpu.roll(x, C - 1, axis=1)
        return cs + pltpu.roll(cs, 1, axis=0) + pltpu.roll(cs, R - 1, axis=0)

    inv9 = 1.0 / 9.0
    mu_p = win9(p) * inv9
    mu_t = win9(t) * inv9
    e_pp = win9(p * p) * inv9
    e_tt = win9(t * t) * inv9
    e_pt = win9(p * t) * inv9
    var_p = e_pp - mu_p * mu_p                # C2 keeps den stable if slightly <0
    var_t = e_tt - mu_t * mu_t
    cov = e_pt - mu_p * mu_t
    num = (2.0 * mu_p * mu_t + _C1) * (2.0 * cov + _C2)
    den = (mu_p * mu_p + mu_t * mu_t + _C1) * (var_p + var_t + _C2)
    ssim_w = (num / den) * wi                 # wi = interior / ((H-2)*(W-2))

    # per-image interior means via two tiny matmuls on the (idle) MXU
    rows = jnp.dot(rsel_ref[...], ssim_w, preferred_element_type=jnp.float32)
    per_img = jnp.dot(rows, csel_ref[...], preferred_element_type=jnp.float32)
    # selector padding slots have per_img == 0 -> contribute exactly 1.0 each,
    # compensated by the static fake_slots constant.
    ssim_part = jnp.sum(jnp.clip(1.0 - per_img, 0.0, 1.0)) - fake_slots

    # ---- write this block's partials to its own (8,128) output tile -------
    r8 = lax.broadcasted_iota(jnp.int32, (8, 128), 0)
    c8 = lax.broadcasted_iota(jnp.int32, (8, 128), 1)
    out_ref[0] = (jnp.where((r8 == 0) & (c8 == 0), dg_part, 0.0)
                  + jnp.where((r8 == 0) & (c8 == 1), ssim_part, 0.0))


@jax.jit
def loss_fn(y_pred, y_true):
    B, Cc, H, W = y_pred.shape
    n = B * Cc
    p = y_pred.reshape(n, H, W)               # keep native dtype (no f32 copy)
    t = y_true.reshape(n, H, W)

    # ---- static packing plan: lane-dense packing + multi-image blocks -----
    LP = max(1, min(128 // W, n)) if W < 128 else 1   # images packed along lanes
    n_grp = -(-n // LP)                               # packed row-groups
    per_grp = H * LP * W
    NB = max(1, min(n_grp, (64 * 1024) // per_grp))   # groups per grid step
    G = -(-n_grp // NB)                               # grid size
    n_pad = G * NB * LP
    NBH, LPW = NB * H, LP * W

    def pack(x):
        if n_pad != n:                          # zero images contribute exactly 0
            x = jnp.concatenate(
                [x, jnp.zeros((n_pad - n, H, W), x.dtype)], axis=0)
        x = x.reshape(G, NB, LP, H, W).transpose(0, 1, 3, 2, 4)
        return x.reshape(G, NBH, LPW)

    pp, tt = pack(p), pack(t)

    # ---- constant pre-scaled mask maps (DMA'd once: constant index_map) ---
    row_in = jnp.arange(NBH, dtype=jnp.int32)[:, None] % H     # (NBH, 1)
    col_in = jnp.arange(LPW, dtype=jnp.int32)[None, :] % W     # (1, LPW)
    ones = jnp.ones((NBH, LPW), jnp.float32)
    wx = ones * (col_in < W - 1) * (1.0 / (H * (W - 1)))
    wy = ones * (row_in < H - 1) * (1.0 / ((H - 1) * W))
    wi = (ones * ((row_in >= 1) & (row_in <= H - 2))
               * ((col_in >= 1) & (col_in <= W - 2))
          * (1.0 / ((H - 2) * (W - 2))))
    w = jnp.stack([wx, wy, wi], axis=0)                        # (3, NBH, LPW)

    # one-hot selectors for per-image SSIM sums (padded to MXU-friendly dims)
    NB8 = _round_up(NB, 8)
    LP8 = _round_up(LP, 8)
    rsel = (jnp.arange(NB8)[:, None] ==
            (jnp.arange(NBH)[None, :] // H)).astype(jnp.float32)   # (NB8, NBH)
    csel = ((jnp.arange(LPW)[:, None] // W) ==
            jnp.arange(LP8)[None, :]).astype(jnp.float32)          # (LPW, LP8)
    fake_slots = float(NB8 * LP8 - NB * LP)

    kernel = functools.partial(_loss_kernel,
                               inv_hw=1.0 / (H * W),
                               fake_slots=fake_slots)

    parts = pl.pallas_call(
        kernel,
        out_shape=jax.ShapeDtypeStruct((G, 8, 128), jnp.float32),
        grid_spec=pltpu.PrefetchScalarGridSpec(
            num_scalar_prefetch=0,
            grid=(G,),
            in_specs=[
                pl.BlockSpec((1, NBH, LPW), lambda g: (g, 0, 0)),
                pl.BlockSpec((1, NBH, LPW), lambda g: (g, 0, 0)),
                pl.BlockSpec((3, NBH, LPW), lambda g: (0, 0, 0)),
                pl.BlockSpec((NB8, NBH), lambda g: (0, 0)),
                pl.BlockSpec((LPW, LP8), lambda g: (0, 0)),
            ],
            out_specs=pl.BlockSpec((1, 8, 128), lambda g: (g, 0, 0)),
        ),
        compiler_params=pltpu.CompilerParams(
            dimension_semantics=("parallel",),      # lets v7x use both TCs
            vmem_limit_bytes=32 * 1024 * 1024),
    )(pp, tt, w, rsel, csel)

    sums = jnp.sum(parts, axis=0)                   # (8, 128)
    inv_n = 1.0 / n
    depth_plus_grad = sums[0, 0] * inv_n            # DepthLoss + GradientLoss
    ssim_l = sums[0, 1] * inv_n                     # SSIMLoss
    # matches: depth_loss + gradient_loss + ssim_loss / 2
    return depth_plus_grad + ssim_l * 0.5


if __name__ == "__main__":
    key = jax.random.PRNGKey(0)
    k1, k2 = jax.random.split(key)
    y_pred = jax.random.uniform(k1, (2, 1, 16, 16), dtype=jnp.float32)
    y_true = jax.random.uniform(k2, (2, 1, 16, 16), dtype=jnp.float32)

    out = loss_fn(y_pred, y_true)
    jax.block_until_ready(out)
    assert out.shape == () and bool(jnp.isfinite(out))
    print("KERNEL_OK")
</pallas_src>

<mosaic_0001>
module attributes {stable_mosaic.version = 11 : i64} {
  func.func @_loss_kernel(%arg0: i32, %arg1: memref<1x16x32xf32, #tpu.memory_space<vmem>>, %arg2: memref<1x16x32xf32, #tpu.memory_space<vmem>>, %arg3: memref<3x16x32xf32, #tpu.memory_space<vmem>>, %arg4: memref<8x16xf32, #tpu.memory_space<vmem>>, %arg5: memref<32x8xf32, #tpu.memory_space<vmem>>, %arg6: memref<1x8x128xf32, #tpu.memory_space<vmem>>) attributes {dimension_semantics = [#tpu.dimension_semantics<parallel>], iteration_bounds = array<i64: 1>, scalar_prefetch = 0 : i64, scratch_operands = 0 : i64, tpu.core_type = #tpu.core_type<tc>, window_params = [{transform_indices = @transform_0, window_bounds = array<i64: 1, 16, 32>}, {transform_indices = @transform_1, window_bounds = array<i64: 1, 16, 32>}, {pipeline_mode = #tpu.pipeline_mode<synchronous>, transform_indices = @transform_2, window_bounds = array<i64: 3, 16, 32>}, {pipeline_mode = #tpu.pipeline_mode<synchronous>, transform_indices = @transform_3, window_bounds = array<i64: 8, 16>}, {pipeline_mode = #tpu.pipeline_mode<synchronous>, transform_indices = @transform_4, window_bounds = array<i64: 32, 8>}, {transform_indices = @transform_5, window_bounds = array<i64: 1, 8, 128>}]} {
    %c0 = arith.constant 0 : index
    %c0_0 = arith.constant 0 : index
    %c0_1 = arith.constant 0 : index
    %0 = vector.load %arg1[%c0, %c0_0, %c0_1] : memref<1x16x32xf32, #tpu.memory_space<vmem>>, vector<1x16x32xf32>
    %1 = vector.shape_cast %0 : vector<1x16x32xf32> to vector<16x32xf32>
    %c0_2 = arith.constant 0 : index
    %c0_3 = arith.constant 0 : index
    %c0_4 = arith.constant 0 : index
    %2 = vector.load %arg2[%c0_2, %c0_3, %c0_4] : memref<1x16x32xf32, #tpu.memory_space<vmem>>, vector<1x16x32xf32>
    %3 = vector.shape_cast %2 : vector<1x16x32xf32> to vector<16x32xf32>
    %c0_5 = arith.constant 0 : index
    %c0_6 = arith.constant 0 : index
    %c0_7 = arith.constant 0 : index
    %4 = vector.load %arg3[%c0_5, %c0_6, %c0_7] : memref<3x16x32xf32, #tpu.memory_space<vmem>>, vector<1x16x32xf32>
    %5 = vector.shape_cast %4 : vector<1x16x32xf32> to vector<16x32xf32>
    %c1 = arith.constant 1 : index
    %c0_8 = arith.constant 0 : index
    %c0_9 = arith.constant 0 : index
    %6 = vector.load %arg3[%c1, %c0_8, %c0_9] : memref<3x16x32xf32, #tpu.memory_space<vmem>>, vector<1x16x32xf32>
    %7 = vector.shape_cast %6 : vector<1x16x32xf32> to vector<16x32xf32>
    %c2 = arith.constant 2 : index
    %c0_10 = arith.constant 0 : index
    %c0_11 = arith.constant 0 : index
    %8 = vector.load %arg3[%c2, %c0_10, %c0_11] : memref<3x16x32xf32, #tpu.memory_space<vmem>>, vector<1x16x32xf32>
    %9 = vector.shape_cast %8 : vector<1x16x32xf32> to vector<16x32xf32>
    %10 = arith.subf %1, %3 : vector<16x32xf32>
    %c31_i32 = arith.constant 31 : i32
    %11 = tpu.dynamic_rotate %10 by %c31_i32 dim 1 : vector<16x32xf32>, i32 -> vector<16x32xf32>
    %12 = arith.subf %11, %10 : vector<16x32xf32>
    %c15_i32 = arith.constant 15 : i32
    %13 = tpu.dynamic_rotate %10 by %c15_i32 dim 0 : vector<16x32xf32>, i32 -> vector<16x32xf32>
    %14 = arith.subf %13, %10 : vector<16x32xf32>
    %15 = math.absf %10 : vector<16x32xf32>
    %cst = arith.constant 3.906250e-03 : f32
    %16 = vector.broadcast %cst : f32 to vector<16x32xf32>
    %17 = arith.mulf %15, %16 : vector<16x32xf32>
    %18 = math.absf %12 : vector<16x32xf32>
    %19 = arith.mulf %18, %5 : vector<16x32xf32>
    %20 = arith.addf %17, %19 : vector<16x32xf32>
    %21 = math.absf %14 : vector<16x32xf32>
    %22 = arith.mulf %21, %7 : vector<16x32xf32>
    %23 = arith.addf %20, %22 : vector<16x32xf32>
    %24 = vector.shape_cast %23 : vector<16x32xf32> to vector<1x16x32xf32>
    %cst_12 = arith.constant dense<0.000000e+00> : vector<1xf32>
    %25 = vector.multi_reduction <add>, %24, %cst_12 [1, 2] : vector<1x16x32xf32> to vector<1xf32>
    %26 = vector.shape_cast %25 : vector<1xf32> to vector<1x1x1xf32>
    %27 = vector.extract %26[0, 0, 0] : f32 from vector<1x1x1xf32>
    %c1_i32 = arith.constant 1 : i32
    %28 = tpu.dynamic_rotate %1 by %c1_i32 dim 1 : vector<16x32xf32>, i32 -> vector<16x32xf32>
    %29 = arith.addf %1, %28 : vector<16x32xf32>
    %c31_i32_13 = arith.constant 31 : i32
    %30 = tpu.dynamic_rotate %1 by %c31_i32_13 dim 1 : vector<16x32xf32>, i32 -> vector<16x32xf32>
    %31 = arith.addf %29, %30 : vector<16x32xf32>
    %c1_i32_14 = arith.constant 1 : i32
    %32 = tpu.dynamic_rotate %31 by %c1_i32_14 dim 0 : vector<16x32xf32>, i32 -> vector<16x32xf32>
    %33 = arith.addf %31, %32 : vector<16x32xf32>
    %c15_i32_15 = arith.constant 15 : i32
    %34 = tpu.dynamic_rotate %31 by %c15_i32_15 dim 0 : vector<16x32xf32>, i32 -> vector<16x32xf32>
    %35 = arith.addf %33, %34 : vector<16x32xf32>
    %cst_16 = arith.constant 0.111111112 : f32
    %36 = vector.broadcast %cst_16 : f32 to vector<16x32xf32>
    %37 = arith.mulf %35, %36 : vector<16x32xf32>
    %c1_i32_17 = arith.constant 1 : i32
    %38 = tpu.dynamic_rotate %3 by %c1_i32_17 dim 1 : vector<16x32xf32>, i32 -> vector<16x32xf32>
    %39 = arith.addf %3, %38 : vector<16x32xf32>
    %c31_i32_18 = arith.constant 31 : i32
    %40 = tpu.dynamic_rotate %3 by %c31_i32_18 dim 1 : vector<16x32xf32>, i32 -> vector<16x32xf32>
    %41 = arith.addf %39, %40 : vector<16x32xf32>
    %c1_i32_19 = arith.constant 1 : i32
    %42 = tpu.dynamic_rotate %41 by %c1_i32_19 dim 0 : vector<16x32xf32>, i32 -> vector<16x32xf32>
    %43 = arith.addf %41, %42 : vector<16x32xf32>
    %c15_i32_20 = arith.constant 15 : i32
    %44 = tpu.dynamic_rotate %41 by %c15_i32_20 dim 0 : vector<16x32xf32>, i32 -> vector<16x32xf32>
    %45 = arith.addf %43, %44 : vector<16x32xf32>
    %cst_21 = arith.constant 0.111111112 : f32
    %46 = vector.broadcast %cst_21 : f32 to vector<16x32xf32>
    %47 = arith.mulf %45, %46 : vector<16x32xf32>
    %48 = arith.mulf %1, %1 : vector<16x32xf32>
    %c1_i32_22 = arith.constant 1 : i32
    %49 = tpu.dynamic_rotate %48 by %c1_i32_22 dim 1 : vector<16x32xf32>, i32 -> vector<16x32xf32>
    %50 = arith.addf %48, %49 : vector<16x32xf32>
    %c31_i32_23 = arith.constant 31 : i32
    %51 = tpu.dynamic_rotate %48 by %c31_i32_23 dim 1 : vector<16x32xf32>, i32 -> vector<16x32xf32>
    %52 = arith.addf %50, %51 : vector<16x32xf32>
    %c1_i32_24 = arith.constant 1 : i32
    %53 = tpu.dynamic_rotate %52 by %c1_i32_24 dim 0 : vector<16x32xf32>, i32 -> vector<16x32xf32>
    %54 = arith.addf %52, %53 : vector<16x32xf32>
    %c15_i32_25 = arith.constant 15 : i32
    %55 = tpu.dynamic_rotate %52 by %c15_i32_25 dim 0 : vector<16x32xf32>, i32 -> vector<16x32xf32>
    %56 = arith.addf %54, %55 : vector<16x32xf32>
    %cst_26 = arith.constant 0.111111112 : f32
    %57 = vector.broadcast %cst_26 : f32 to vector<16x32xf32>
    %58 = arith.mulf %56, %57 : vector<16x32xf32>
    %59 = arith.mulf %3, %3 : vector<16x32xf32>
    %c1_i32_27 = arith.constant 1 : i32
    %60 = tpu.dynamic_rotate %59 by %c1_i32_27 dim 1 : vector<16x32xf32>, i32 -> vector<16x32xf32>
    %61 = arith.addf %59, %60 : vector<16x32xf32>
    %c31_i32_28 = arith.constant 31 : i32
    %62 = tpu.dynamic_rotate %59 by %c31_i32_28 dim 1 : vector<16x32xf32>, i32 -> vector<16x32xf32>
    %63 = arith.addf %61, %62 : vector<16x32xf32>
    %c1_i32_29 = arith.constant 1 : i32
    %64 = tpu.dynamic_rotate %63 by %c1_i32_29 dim 0 : vector<16x32xf32>, i32 -> vector<16x32xf32>
    %65 = arith.addf %63, %64 : vector<16x32xf32>
    %c15_i32_30 = arith.constant 15 : i32
    %66 = tpu.dynamic_rotate %63 by %c15_i32_30 dim 0 : vector<16x32xf32>, i32 -> vector<16x32xf32>
    %67 = arith.addf %65, %66 : vector<16x32xf32>
    %cst_31 = arith.constant 0.111111112 : f32
    %68 = vector.broadcast %cst_31 : f32 to vector<16x32xf32>
    %69 = arith.mulf %67, %68 : vector<16x32xf32>
    %70 = arith.mulf %1, %3 : vector<16x32xf32>
    %c1_i32_32 = arith.constant 1 : i32
    %71 = tpu.dynamic_rotate %70 by %c1_i32_32 dim 1 : vector<16x32xf32>, i32 -> vector<16x32xf32>
    %72 = arith.addf %70, %71 : vector<16x32xf32>
    %c31_i32_33 = arith.constant 31 : i32
    %73 = tpu.dynamic_rotate %70 by %c31_i32_33 dim 1 : vector<16x32xf32>, i32 -> vector<16x32xf32>
    %74 = arith.addf %72, %73 : vector<16x32xf32>
    %c1_i32_34 = arith.constant 1 : i32
    %75 = tpu.dynamic_rotate %74 by %c1_i32_34 dim 0 : vector<16x32xf32>, i32 -> vector<16x32xf32>
    %76 = arith.addf %74, %75 : vector<16x32xf32>
    %c15_i32_35 = arith.constant 15 : i32
    %77 = tpu.dynamic_rotate %74 by %c15_i32_35 dim 0 : vector<16x32xf32>, i32 -> vector<16x32xf32>
    %78 = arith.addf %76, %77 : vector<16x32xf32>
    %cst_36 = arith.constant 0.111111112 : f32
    %79 = vector.broadcast %cst_36 : f32 to vector<16x32xf32>
    %80 = arith.mulf %78, %79 : vector<16x32xf32>
    %81 = arith.mulf %37, %37 : vector<16x32xf32>
    %82 = arith.subf %58, %81 : vector<16x32xf32>
    %83 = arith.mulf %47, %47 : vector<16x32xf32>
    %84 = arith.subf %69, %83 : vector<16x32xf32>
    %85 = arith.mulf %37, %47 : vector<16x32xf32>
    %86 = arith.subf %80, %85 : vector<16x32xf32>
    %cst_37 = arith.constant 2.000000e+00 : f32
    %87 = vector.broadcast %cst_37 : f32 to vector<16x32xf32>
    %88 = arith.mulf %87, %37 : vector<16x32xf32>
    %89 = arith.mulf %88, %47 : vector<16x32xf32>
    %cst_38 = arith.constant 9.99999974E-5 : f32
    %90 = vector.broadcast %cst_38 : f32 to vector<16x32xf32>
    %91 = arith.addf %89, %90 : vector<16x32xf32>
    %cst_39 = arith.constant 2.000000e+00 : f32
    %92 = vector.broadcast %cst_39 : f32 to vector<16x32xf32>
    %93 = arith.mulf %92, %86 : vector<16x32xf32>
    %cst_40 = arith.constant 8.99999984E-4 : f32
    %94 = vector.broadcast %cst_40 : f32 to vector<16x32xf32>
    %95 = arith.addf %93, %94 : vector<16x32xf32>
    %96 = arith.mulf %91, %95 : vector<16x32xf32>
    %97 = arith.mulf %37, %37 : vector<16x32xf32>
    %98 = arith.mulf %47, %47 : vector<16x32xf32>
    %99 = arith.addf %97, %98 : vector<16x32xf32>
    %cst_41 = arith.constant 9.99999974E-5 : f32
    %100 = vector.broadcast %cst_41 : f32 to vector<16x32xf32>
    %101 = arith.addf %99, %100 : vector<16x32xf32>
    %102 = arith.addf %82, %84 : vector<16x32xf32>
    %cst_42 = arith.constant 8.99999984E-4 : f32
    %103 = vector.broadcast %cst_42 : f32 to vector<16x32xf32>
    %104 = arith.addf %102, %103 : vector<16x32xf32>
    %105 = arith.mulf %101, %104 : vector<16x32xf32>
    %106 = arith.divf %96, %105 : vector<16x32xf32>
    %107 = arith.mulf %106, %9 : vector<16x32xf32>
    %c0_43 = arith.constant 0 : index
    %c0_44 = arith.constant 0 : index
    %108 = vector.load %arg4[%c0_43, %c0_44] : memref<8x16xf32, #tpu.memory_space<vmem>>, vector<8x16xf32>
    %cst_45 = arith.constant dense<0.000000e+00> : vector<8x32xf32>
    %109 = tpu.matmul %108, %107, %cst_45 {dimension_numbers = #tpu.dot_dimension_numbers<[1], [0], [0], [1], [0, 0, 1, 1], [], []>} : vector<8x16xf32>, vector<16x32xf32>, vector<8x32xf32> -> vector<8x32xf32>
    %c0_46 = arith.constant 0 : index
    %c0_47 = arith.constant 0 : index
    %110 = vector.load %arg5[%c0_46, %c0_47] : memref<32x8xf32, #tpu.memory_space<vmem>>, vector<32x8xf32>
    %cst_48 = arith.constant dense<0.000000e+00> : vector<8x8xf32>
    %111 = tpu.matmul %109, %110, %cst_48 {dimension_numbers = #tpu.dot_dimension_numbers<[1], [0], [0], [1], [0, 0, 1, 1], [], []>} : vector<8x32xf32>, vector<32x8xf32>, vector<8x8xf32> -> vector<8x8xf32>
    %cst_49 = arith.constant 1.000000e+00 : f32
    %112 = vector.broadcast %cst_49 : f32 to vector<8x8xf32>
    %113 = arith.subf %112, %111 : vector<8x8xf32>
    %cst_50 = arith.constant 0.000000e+00 : f32
    %cst_51 = arith.constant 1.000000e+00 : f32
    %114 = vector.broadcast %cst_50 : f32 to vector<8x8xf32>
    %115 = arith.maximumf %114, %113 : vector<8x8xf32>
    %116 = vector.broadcast %cst_51 : f32 to vector<8x8xf32>
    %117 = arith.minimumf %116, %115 : vector<8x8xf32>
    %118 = vector.shape_cast %117 : vector<8x8xf32> to vector<1x8x8xf32>
    %cst_52 = arith.constant dense<0.000000e+00> : vector<1xf32>
    %119 = vector.multi_reduction <add>, %118, %cst_52 [1, 2] : vector<1x8x8xf32> to vector<1xf32>
    %120 = vector.shape_cast %119 : vector<1xf32> to vector<1x1x1xf32>
    %121 = vector.extract %120[0, 0, 0] : f32 from vector<1x1x1xf32>
    %cst_53 = arith.constant 6.200000e+01 : f32
    %122 = arith.subf %121, %cst_53 : f32
    %123 = tpu.iota {dimensions = array<i32: 0>} : vector<8x128xi32>
    %124 = tpu.iota {dimensions = array<i32: 1>} : vector<8x128xi32>
    %c0_i32 = arith.constant 0 : i32
    %125 = vector.broadcast %c0_i32 : i32 to vector<8x128xi32>
    %126 = arith.cmpi eq, %123, %125 : vector<8x128xi32>
    %c0_i32_54 = arith.constant 0 : i32
    %127 = vector.broadcast %c0_i32_54 : i32 to vector<8x128xi32>
    %128 = arith.cmpi eq, %124, %127 : vector<8x128xi32>
    %129 = arith.andi %126, %128 : vector<8x128xi1>
    %cst_55 = arith.constant 0.000000e+00 : f32
    %130 = vector.broadcast %27 : f32 to vector<8x128xf32>
    %131 = vector.broadcast %cst_55 : f32 to vector<8x128xf32>
    %132 = arith.select %129, %130, %131 : vector<8x128xi1>, vector<8x128xf32>
    %c0_i32_56 = arith.constant 0 : i32
    %133 = vector.broadcast %c0_i32_56 : i32 to vector<8x128xi32>
    %134 = arith.cmpi eq, %123, %133 : vector<8x128xi32>
    %c1_i32_57 = arith.constant 1 : i32
    %135 = vector.broadcast %c1_i32_57 : i32 to vector<8x128xi32>
    %136 = arith.cmpi eq, %124, %135 : vector<8x128xi32>
    %137 = arith.andi %134, %136 : vector<8x128xi1>
    %cst_58 = arith.constant 0.000000e+00 : f32
    %138 = vector.broadcast %122 : f32 to vector<8x128xf32>
    %139 = vector.broadcast %cst_58 : f32 to vector<8x128xf32>
    %140 = arith.select %137, %138, %139 : vector<8x128xi1>, vector<8x128xf32>
    %141 = arith.addf %132, %140 : vector<8x128xf32>
    %c0_59 = arith.constant 0 : index
    %c0_60 = arith.constant 0 : index
    %c0_61 = arith.constant 0 : index
    %142 = vector.load %arg6[%c0_59, %c0_60, %c0_61] : memref<1x8x128xf32, #tpu.memory_space<vmem>>, vector<1x8x128xf32>
    %143 = vector.shape_cast %142 : vector<1x8x128xf32> to vector<8x128xf32>
    %144 = vector.shape_cast %141 : vector<8x128xf32> to vector<1x8x128xf32>
    tpu.vector_store %arg6[%c0_59, %c0_60, %c0_61], %144 {strides = array<i32>} : memref<1x8x128xf32, #tpu.memory_space<vmem>>, vector<1x8x128xf32>,
    return
  }
  func.func @transform_0(%arg0: i32) -> (i32, i32, i32) {
    %c0_i32 = arith.constant 0 : i32
    %c0_i32_0 = arith.constant 0 : i32
    %c0_i32_1 = arith.constant 0 : i32
    return %arg0, %c0_i32, %c0_i32_0 : i32, i32, i32
  }
  func.func @transform_1(%arg0: i32) -> (i32, i32, i32) {
    %c0_i32 = arith.constant 0 : i32
    %c0_i32_0 = arith.constant 0 : i32
    %c0_i32_1 = arith.constant 0 : i32
    return %arg0, %c0_i32, %c0_i32_0 : i32, i32, i32
  }
  func.func @transform_2(%arg0: i32) -> (i32, i32, i32) {
    %c0_i32 = arith.constant 0 : i32
    %c0_i32_0 = arith.constant 0 : i32
    %c0_i32_1 = arith.constant 0 : i32
    %c0_i32_2 = arith.constant 0 : i32
    return %c0_i32, %c0_i32_0, %c0_i32_1 : i32, i32, i32
  }
  func.func @transform_3(%arg0: i32) -> (i32, i32) {
    %c0_i32 = arith.constant 0 : i32
    %c0_i32_0 = arith.constant 0 : i32
    %c0_i32_1 = arith.constant 0 : i32
    return %c0_i32, %c0_i32_0 : i32, i32
  }
  func.func @transform_4(%arg0: i32) -> (i32, i32) {
    %c0_i32 = arith.constant 0 : i32
    %c0_i32_0 = arith.constant 0 : i32
    %c0_i32_1 = arith.constant 0 : i32
    return %c0_i32, %c0_i32_0 : i32, i32
  }
  func.func @transform_5(%arg0: i32) -> (i32, i32, i32) {
    %c0_i32 = arith.constant 0 : i32
    %c0_i32_0 = arith.constant 0 : i32
    %c0_i32_1 = arith.constant 0 : i32
    return %arg0, %c0_i32, %c0_i32_0 : i32, i32, i32
  }
}

</mosaic_0001>

<bundles_post_ra>
// kernel: loss_fn.1
= control target key start
LH: loop header
LB: loop body
LE: loop exit
PB: predicated region body
PF: predicated region fallthrough
CT: control target
= control target key end

     0   :  { %s619_s22 = smov 32   ;;  %vm34_vm0 = vcmask 1047808   ;;  %v622_v50 = vmov 0.0|0.0   ;;  %vm623_vm1 = vmmov 0   ;;  %v624_v51 = vmov 0.0   ;;  %s625_s13 = smov 1   ;;  %s934_s0 = inlined_call_operand.vmem [shape: f32[1,16,32], index: 0, kind: input, shape index: {}]   ;;  %s935_s1 = inlined_call_operand.vmem [shape: f32[1,16,32], index: 1, kind: input, shape index: {}]   ;;  %s936_s4 = inlined_call_operand.vmem [shape: f32[32,8], index: 4, kind: input, shape index: {}]   ;;  %s937_s2 = inlined_call_operand.vmem [shape: f32[3,16,32], index: 2, kind: input, shape index: {}]   ;;  %s938_s3 = inlined_call_operand.vmem [shape: f32[8,16], index: 3, kind: input, shape index: {}]   ;;  %s939_s5 = inlined_call_operand.vmem [shape: f32[1,8,128], index: 5, kind: output, shape index: {}]  }
   0x1   :  { %v659_v0 = vld [vmem:[%s934_s0] sm:$0xff]  ;;  %v673_v2 = vld [vmem:[%s934_s0 + $0x8] sm:$0xff]  ;;  %s620_s0 = smov 97   ;;  %595 = vmatprep.subr.bf16.mxu0 %v622_v50  ;;  %598 = vmatprep.subr.bf16.mxu1 %v622_v50  ;;  %v455_v56 = vld [vmem:[%s936_s4 + $0x10] sm:$0xff]  ;;  %vm379_vm4 = vcmask 130048   ;;  %vm98_vm5 = vcmask 261120  }
   0x2   :  { %v664_v1 = vld [vmem:[%s935_s1] sm:$0xff]  ;;  %111 = vrot.lane.b32.xlu0 %v659_v0, %s619_s22  ;;  %v678_v3 = vld [vmem:[%s935_s1 + $0x8] sm:$0xff]  ;;  %v686_v4 = vmul.f32 %v659_v0, %v659_v0  ;;  %v690_v5 = vmul.f32 %v673_v2, %v673_v2  ;;  %s621_s1 = smov 127   ;;  %581 = vmatprep.mubr.msk.f32.mxu0 %vm623_vm1, %v624_v51  ;;  %v456_v58 = vld [vmem:[%s936_s4 + $0x18] sm:$0xff]  ;;  %vm533_vm6 = vcmask 64512  }
   0x3   :  { %156 = vrot.lane.b32.xlu1 %v664_v1, %s619_s22  ;;  %v698_v6 = vmul.f32 %v664_v1, %v664_v1  ;;  %v702_v7 = vmul.f32 %v678_v3, %v678_v3  ;;  %v710_v8 = vmul.f32 %v664_v1, %v659_v0  ;;  %v714_v9 = vmul.f32 %v678_v3, %v673_v2  ;;  %v453_v54 = vld [vmem:[%s936_s4] sm:$0xff]  ;;  %v454_v55 = vld [vmem:[%s936_s4 + $0x8] sm:$0xff] }
   0x4   :  { %592 = vmatprep.mubr.msk.f32.mxu1 %vm623_vm1, %v624_v51  ;;  %v792_v52 = vsub.f32 %v673_v2, %v678_v3  ;;  %v796_v53 = vsub.f32 %v659_v0, %v664_v1  ;;  %v599_v57 = vpack.c.bf16 %v454_v55, %v453_v54  ;;  %v602_v59 = vpack.c.bf16 %v456_v58, %v455_v56 }
   0x6   :  { %114 = vrot.lane.b32.xlu0 %v673_v2, %s619_s22  ;;  %600 = vmatpush3.bf16.msra.mxu1 %v599_v57 }
   0x7   :  { %159 = vrot.lane.b32.xlu1 %v678_v3, %s619_s22  ;;  %601 = vmatprep.subr.bf16.mxu1 %v622_v50 }
   0xa   :  { %202 = vrot.lane.b32.xlu0 %v686_v4, %s619_s22  ;;  %603 = vmatpush3.bf16.msra.mxu1 %v602_v59 }
   0xb   :  { %205 = vrot.lane.b32.xlu1 %v690_v5, %s619_s22 }
   0xe   :  { %248 = vrot.lane.b32.xlu0 %v698_v6, %s619_s22 }
   0xf   :  { %251 = vrot.lane.b32.xlu1 %v702_v7, %s619_s22 }
  0x12   :  { %294 = vrot.lane.b32.xlu0 %v710_v8, %s619_s22 }
  0x13   :  { %297 = vrot.lane.b32.xlu1 %v714_v9, %s619_s22 }
  0x74   :  { %v112_v10 = vpop.permute.xlu0 %111 }
  0x75   :  { %v157_v11 = vpop.permute.xlu1 %156  ;;  %v113_v12 = vsel %vm34_vm0, %v112_v10, %v659_v0 }
  0x76   :  { %117 = vrot.lane.b32.xlu0 %v113_v12, %s619_s22  ;;  %v158_v13 = vsel %vm34_vm0, %v157_v11, %v664_v1 }
  0x78   :  { %v115_v14 = vpop.permute.xlu0 %114 }
  0x79   :  { %v160_v15 = vpop.permute.xlu1 %159  ;;  %v116_v16 = vsel %vm34_vm0, %v115_v14, %v673_v2 }
  0x7a   :  { %119 = vrot.lane.b32.xlu1 %v116_v16, %s619_s22  ;;  %162 = vrot.lane.b32.xlu0 %v158_v13, %s619_s22  ;;  %v161_v17 = vsel %vm34_vm0, %v160_v15, %v678_v3  ;;  %v59_v13 = vlaneseq }
  0x7c   :  { %v203_v18 = vpop.permute.xlu0 %202 }
  0x7d   :  { %v206_v19 = vpop.permute.xlu1 %205  ;;  %v204_v20 = vsel %vm34_vm0, %v203_v18, %v686_v4 }
  0x7e   :  { %164 = vrot.lane.b32.xlu1 %v161_v17, %s619_s22  ;;  %208 = vrot.lane.b32.xlu0 %v204_v20, %s619_s22  ;;  %v207_v21 = vsel %vm34_vm0, %v206_v19, %v690_v5 }
  0x80   :  { %v249_v22 = vpop.permute.xlu0 %248 }
  0x81   :  { %v252_v23 = vpop.permute.xlu1 %251  ;;  %v250_v24 = vsel %vm34_vm0, %v249_v22, %v698_v6 }
  0x82   :  { %210 = vrot.lane.b32.xlu1 %v207_v21, %s619_s22  ;;  %254 = vrot.lane.b32.xlu0 %v250_v24, %s619_s22  ;;  %v253_v25 = vsel %vm34_vm0, %v252_v23, %v702_v7  ;;  %v819_v21 = vshrl.u32 %v59_v13, 7 }
  0x84   :  { %v295_v26 = vpop.permute.xlu0 %294  ;;  %vm143_vm2 = vcmp.lt.s32.totalorder %v819_v21, 1  ;;  %vm61_vm3 = vcmp.lt.s32.totalorder %v819_v21, 7  ;;  %vm547_vm7 = vcmp.eq.s32.totalorder %v819_v21, 0 }
  0x85   :  { %v298_v27 = vpop.permute.xlu1 %297  ;;  %v296_v28 = vsel %vm34_vm0, %v295_v26, %v710_v8 }
  0x86   :  { %256 = vrot.lane.b32.xlu1 %v253_v25, %s619_s22  ;;  %300 = vrot.lane.b32.xlu0 %v296_v28, %s619_s22  ;;  %v299_v29 = vsel %vm34_vm0, %v298_v27, %v714_v9 }
  0x8a   :  { %302 = vrot.lane.b32.xlu1 %v299_v29, %s619_s22 }
  0xe8   :  { %v118_v30 = vpop.permute.xlu0 %117 }
  0xe9   :  { %v121_v31 = vsel %vm34_vm0, %v118_v30, %v659_v0 }
  0xea   :  { %125 = vrot.lane.b32.xlu0 %v121_v31, %s620_s0 }
  0xec   :  { %v120_v32 = vpop.permute.xlu1 %119  ;;  %v163_v33 = vpop.permute.xlu0 %162 }
  0xed   :  { %v122_v34 = vsel %vm34_vm0, %v120_v32, %v673_v2  ;;  %v166_v35 = vsel %vm34_vm0, %v163_v33, %v664_v1 }
  0xee   :  { %127 = vrot.lane.b32.xlu1 %v122_v34, %s620_s0  ;;  %170 = vrot.lane.b32.xlu0 %v166_v35, %s620_s0 }
  0xf0   :  { %v165_v36 = vpop.permute.xlu1 %164  ;;  %v209_v38 = vpop.permute.xlu0 %208 }
  0xf1   :  { %v167_v37 = vsel %vm34_vm0, %v165_v36, %v678_v3  ;;  %v212_v40 = vsel %vm34_vm0, %v209_v38, %v686_v4 }
  0xf2   :  { %172 = vrot.lane.b32.xlu1 %v167_v37, %s620_s0  ;;  %133 = vrot.lane.b32.xlu0 %v121_v31, %s621_s1 }
  0xf4   :  { %v211_v39 = vpop.permute.xlu1 %210  ;;  %v255_v41 = vpop.permute.xlu0 %254 }
  0xf5   :  { %v213_v42 = vsel %vm34_vm0, %v211_v39, %v690_v5  ;;  %v258_v43 = vsel %vm34_vm0, %v255_v41, %v698_v6 }
  0xf6   :  { %135 = vrot.lane.b32.xlu1 %v122_v34, %s621_s1  ;;  %178 = vrot.lane.b32.xlu0 %v166_v35, %s621_s1 }
  0xf8   :  { %v257_v44 = vpop.permute.xlu1 %256  ;;  %v301_v46 = vpop.permute.xlu0 %300 }
  0xf9   :  { %v259_v45 = vsel %vm34_vm0, %v257_v44, %v702_v7  ;;  %v304_v47 = vsel %vm34_vm0, %v301_v46, %v710_v8 }
  0xfa   :  { %180 = vrot.lane.b32.xlu1 %v167_v37, %s621_s1  ;;  %216 = vrot.lane.b32.xlu0 %v212_v40, %s620_s0 }
  0xfc   :  { %v303_v48 = vpop.permute.xlu1 %302 }
  0xfd   :  { %v305_v49 = vsel %vm34_vm0, %v303_v48, %v714_v9 }
  0xfe   :  { %218 = vrot.lane.b32.xlu1 %v213_v42, %s620_s0  ;;  %262 = vrot.lane.b32.xlu0 %v258_v43, %s620_s0 }
 0x102   :  { %264 = vrot.lane.b32.xlu1 %v259_v45, %s620_s0  ;;  %224 = vrot.lane.b32.xlu0 %v212_v40, %s621_s1 }
 0x106   :  { %226 = vrot.lane.b32.xlu1 %v213_v42, %s621_s1  ;;  %270 = vrot.lane.b32.xlu0 %v258_v43, %s621_s1 }
 0x10a   :  { %272 = vrot.lane.b32.xlu1 %v259_v45, %s621_s1  ;;  %308 = vrot.lane.b32.xlu0 %v304_v47, %s620_s0 }
 0x10e   :  { %310 = vrot.lane.b32.xlu1 %v305_v49, %s620_s0  ;;  %316 = vrot.lane.b32.xlu0 %v304_v47, %s621_s1 }
 0x112   :  { %318 = vrot.lane.b32.xlu1 %v305_v49, %s621_s1  ;;  %35 = vrot.lane.b32.xlu0 %v796_v53, %s619_s22 }
 0x116   :  { %38 = vrot.lane.b32.xlu1 %v792_v52, %s619_s22 }
 0x15c   :  { %v126_v60 = vpop.permute.xlu0 %125 }
 0x15d   :  { %v131_v20 = vadd.f32 %v126_v60, %v659_v0 }
 0x160   :  { %v128_v61 = vpop.permute.xlu1 %127  ;;  %v171_v62 = vpop.permute.xlu0 %170 }
 0x161   :  { %v176_v14 = vadd.f32 %v171_v62, %v664_v1  ;;  %v132_v15 = vadd.f32 %v128_v61, %v673_v2 }
 0x164   :  { %v173_v63 = vpop.permute.xlu1 %172  ;;  %v134_v10 = vpop.permute.xlu0 %133 }
 0x165   :  { %v177_v16 = vadd.f32 %v173_v63, %v678_v3  ;;  %v139_v24 = vadd.f32 %v134_v10, %v131_v20 }
 0x167   :  { %v141_v3 = vrot.slane %v139_v24, 7  ;;  %v148_v41 = vrot.slane %v139_v24, 1 }
 0x168   :  { %v136_v11 = vpop.permute.xlu1 %135  ;;  %v179_v12 = vpop.permute.xlu0 %178 }
 0x169   :  { %v184_v17 = vadd.f32 %v179_v12, %v176_v14  ;;  %v140_v22 = vadd.f32 %v136_v11, %v132_v15 }
 0x16b   :  { %v186_v25 = vrot.slane %v184_v17, 7  ;;  %v142_v1 = vrot.slane %v140_v22, 7  ;;  %v149_v36 = vrot.slane %v140_v22, 1  ;;  %v192_v37 = vrot.slane %v184_v17, 1 }
 0x16c   :  { %v181_v18 = vpop.permute.xlu1 %180  ;;  %v217_v19 = vpop.permute.xlu0 %216 }
 0x16d   :  { %v185_v23 = vadd.f32 %v181_v18, %v177_v16  ;;  %v144_v32 = vsel %vm143_vm2, %v141_v3, %v142_v1  ;;  %v145_v33 = vsel %vm143_vm2, %v142_v1, %v141_v3  ;;  %v222_v35 = vadd.f32 %v217_v19, %v686_v4 }
 0x16e   :  { %v146_v42 = vadd.f32 %v145_v33, %v139_v24  ;;  %v147_v43 = vadd.f32 %v144_v32, %v140_v22  ;;  %v150_v50 = vsel %vm61_vm3, %v148_v41, %v149_v36 }
 0x16f   :  { %v187_v26 = vrot.slane %v185_v23, 7  ;;  %v193_v29 = vrot.slane %v185_v23, 1 }
 0x170   :  { %v219_v27 = vpop.permute.xlu1 %218  ;;  %v263_v28 = vpop.permute.xlu0 %262  ;;  %v152_v58 = vadd.f32 %v150_v50, %v146_v42 }
 0x171   :  { %v189_v2 = vsel %vm143_vm2, %v187_v26, %v186_v25  ;;  %v188_v0 = vsel %vm143_vm2, %v186_v25, %v187_v26  ;;  %v223_v39 = vadd.f32 %v219_v27, %v690_v5  ;;  %v194_v44 = vsel %vm61_vm3, %v192_v37, %v193_v29 }
 0x172   :  { %v190_v34 = vadd.f32 %v189_v2, %v184_v17  ;;  %v191_v38 = vadd.f32 %v188_v0, %v185_v23  ;;  %v195_v47 = vsel %vm61_vm3, %v193_v29, %v192_v37  ;;  %v268_v48 = vadd.f32 %v263_v28, %v698_v6 }
 0x173   :  { %v151_v5 = vsel %vm61_vm3, %v149_v36, %v148_v41  ;;  %v154_v27 = vmul.f32 0.11111111, %v152_v58 }
 0x174   :  { %v265_v30 = vpop.permute.xlu1 %264  ;;  %v225_v31 = vpop.permute.xlu0 %224  ;;  %v196_v4 = vadd.f32 %v194_v44, %v190_v34  ;;  %v197_v51 = vadd.f32 %v195_v47, %v191_v38  ;;  %v153_v59 = vadd.f32 %v151_v5, %v147_v43 }
 0x175   :  { %v230_v40 = vadd.f32 %v225_v31, %v222_v35  ;;  %v269_v60 = vadd.f32 %v265_v30, %v702_v7  ;;  %v338_v41 = vmul.f32 %v154_v27, %v154_v27 }
 0x176   :  { %v843_v63 = vmul.f32 0.11111111, %v196_v4  ;;  %v849_v12 = vmul.f32 0.11111111, %v197_v51  ;;  %v155_v2 = vmul.f32 0.11111111, %v153_v59 }
 0x177   :  { %v232_v54 = vrot.slane %v230_v40, 7  ;;  %v238_v6 = vrot.slane %v230_v40, 1 }
 0x178   :  { %v227_v45 = vpop.permute.xlu1 %226  ;;  %v271_v46 = vpop.permute.xlu0 %270  ;;  %v342_v31 = vmul.f32 %v843_v63, %v843_v63  ;;  %v343_v32 = vmul.f32 %v849_v12, %v849_v12  ;;  %v339_v42 = vmul.f32 %v155_v2, %v155_v2 }
 0x179   :  { %v231_v49 = vadd.f32 %v227_v45, %v223_v39  ;;  %v276_v57 = vadd.f32 %v271_v46, %v268_v48 }
 0x17a   :  { %v363_v50 = vadd.f32 %v343_v32, %v339_v42 }
 0x17b   :  { %v233_v55 = vrot.slane %v231_v49, 7  ;;  %v239_v56 = vrot.slane %v231_v49, 1  ;;  %v278_v18 = vrot.slane %v276_v57, 7  ;;  %v284_v3 = vrot.slane %v276_v57, 1 }
 0x17c   :  { %v273_v61 = vpop.permute.xlu1 %272  ;;  %v309_v62 = vpop.permute.xlu0 %308 }
 0x17d   :  { %v234_v10 = vsel %vm143_vm2, %v232_v54, %v233_v55  ;;  %v235_v11 = vsel %vm143_vm2, %v233_v55, %v232_v54  ;;  %v277_v16 = vadd.f32 %v273_v61, %v269_v60  ;;  %v240_v17 = vsel %vm61_vm3, %v238_v6, %v239_v56 }
 0x17e   :  { %v236_v14 = vadd.f32 %v235_v11, %v230_v40  ;;  %v237_v15 = vadd.f32 %v234_v10, %v231_v49  ;;  %v241_v7 = vsel %vm61_vm3, %v239_v56, %v238_v6  ;;  %v314_v19 = vadd.f32 %v309_v62, %v710_v8 }
 0x17f   :  { %v279_v23 = vrot.slane %v277_v16, 7  ;;  %v285_v24 = vrot.slane %v277_v16, 1  ;;  %v362_v49 = vadd.f32 %v342_v31, %v338_v41  ;;  %v365_v11 = vadd.f32 0.0001, %v363_v50 }
 0x180   :  { %v242_v20 = vadd.f32 %v240_v17, %v236_v14  ;;  %v243_v22 = vadd.f32 %v241_v7, %v237_v15  ;;  %v311_v25 = vpop.permute.xlu1 %310  ;;  %v317_v26 = vpop.permute.xlu0 %316  ;;  %v347_v7 = vmul.f32 %v849_v12, %v155_v2 }
 0x181   :  { %v315_v28 = vadd.f32 %v311_v25, %v714_v9  ;;  %v322_v1 = vadd.f32 %v317_v26, %v314_v19  ;;  %v280_v0 = vsel %vm143_vm2, %v278_v18, %v279_v23  ;;  %v281_v29 = vsel %vm143_vm2, %v279_v23, %v278_v18 }
 0x182   :  { %v282_v30 = vadd.f32 %v281_v29, %v276_v57  ;;  %v283_v8 = vadd.f32 %v280_v0, %v277_v16  ;;  %v244_v33 = vmul.f32 0.11111111, %v242_v20  ;;  %v245_v34 = vmul.f32 0.11111111, %v243_v22 }
 0x183   :  { %v286_v9 = vsel %vm61_vm3, %v284_v3, %v285_v24  ;;  %v287_v35 = vsel %vm61_vm3, %v285_v24, %v284_v3  ;;  %v324_v39 = vrot.slane %v322_v1, 7  ;;  %v330_v43 = vrot.slane %v322_v1, 1 }
 0x184   :  { %v319_v36 = vpop.permute.xlu1 %318  ;;  %v288_v37 = vadd.f32 %v286_v9, %v282_v30  ;;  %v289_v38 = vadd.f32 %v287_v35, %v283_v8  ;;  %v340_v4 = vsub.f32 %v244_v33, %v338_v41  ;;  %v341_v48 = vsub.f32 %v245_v34, %v339_v42  ;;  %v36_v33 = vpop.permute.xlu0 %35  ;;  %v564_v35 = vld [vmem:[%s937_s2 + $0x20] sm:$0xff]  ;;  %v25_v41 = vld [vmem:[%s937_s2 + $0x8] sm:$0xff] }
 0x185   :  { %v323_v40 = vadd.f32 %v319_v36, %v315_v28  ;;  %v364_v62 = vadd.f32 0.0001, %v362_v49  ;;  %v346_v18 = vmul.f32 %v843_v63, %v154_v27  ;;  %v351_v24 = vmul.f32 2.0, %v155_v2  ;;  %v565_v2 = vld [vmem:[%s937_s2 + $0x28] sm:$0xff]  ;;  %v24_v42 = vld [vmem:[%s937_s2] sm:$0xff] }
 0x186   :  { %v290_v44 = vmul.f32 0.11111111, %v288_v37  ;;  %v291_v45 = vmul.f32 0.11111111, %v289_v38  ;;  %v350_v26 = vmul.f32 2.0, %v154_v27 }
 0x187   :  { %v325_v46 = vrot.slane %v323_v40, 7  ;;  %v331_v47 = vrot.slane %v323_v40, 1 }
 0x188   :  { %v344_v5 = vsub.f32 %v290_v44, %v342_v31  ;;  %v345_v51 = vsub.f32 %v291_v45, %v343_v32  ;;  %v352_v3 = vmul.f32 %v350_v26, %v843_v63  ;;  %v39_v32 = vpop.permute.xlu1 %38 }
 0x189   :  { %v326_v54 = vsel %vm143_vm2, %v324_v39, %v325_v46  ;;  %v327_v55 = vsel %vm143_vm2, %v325_v46, %v324_v39  ;;  %v332_v60 = vsel %vm61_vm3, %v330_v43, %v331_v47  ;;  %v333_v61 = vsel %vm61_vm3, %v331_v47, %v330_v43  ;;  %v378_v43 = vld [vmem:[%s938_s3] sm:$0xff] }
 0x18a   :  { %v328_v56 = vadd.f32 %v327_v55, %v322_v1  ;;  %v329_v57 = vadd.f32 %v326_v54, %v323_v40  ;;  %v366_v58 = vadd.f32 %v344_v5, %v340_v4  ;;  %v367_v59 = vadd.f32 %v345_v51, %v341_v48 }
 0x18b   :  { %v353_v1 = vmul.f32 %v351_v24, %v849_v12  ;;  %v354_v8 = vadd.f32 0.0001, %v352_v3  ;;  %v40_v27 = vsel %vm34_vm0, %v39_v32, %v792_v52  ;;  %v37_v12 = vsel %vm34_vm0, %v36_v33, %v796_v53 }
 0x18c   :  { %v334_v6 = vadd.f32 %v332_v60, %v328_v56  ;;  %v335_v10 = vadd.f32 %v333_v61, %v329_v57  ;;  %v368_v14 = vadd.f32 0.0009, %v366_v58  ;;  %v369_v15 = vadd.f32 0.0009, %v367_v59  ;;  %43 = vrot.lane.b32.xlu1 %v40_v27, %s619_s22  ;;  %41 = vrot.lane.b32.xlu0 %v37_v12, %s619_s22 }
 0x18d   :  { %v355_v30 = vadd.f32 0.0001, %v353_v1  ;;  %v58_v60 = vrot.slane %v792_v52, 1  ;;  %v57_v61 = vrot.slane %v796_v53, 1 }
 0x18e   :  { %v336_v16 = vmul.f32 0.11111111, %v334_v6  ;;  %v337_v17 = vmul.f32 0.11111111, %v335_v10  ;;  %v371_v19 = vmul.f32 %v369_v15, %v365_v11  ;;  %v370_v20 = vmul.f32 %v368_v14, %v364_v62 }
 0x18f   :  { %v63_v62 = vsel %vm61_vm3, %v58_v60, %v57_v61  ;;  %v62_v6 = vsel %vm61_vm3, %v57_v61, %v58_v60  ;;  %v67_v14 = vand.u32 2147483647, %v792_v52  ;;  %v66_v15 = vand.u32 2147483647, %v796_v53 }
 0x190   :  { %v349_v22 = vsub.f32 %v337_v17, %v347_v7  ;;  %v348_v23 = vsub.f32 %v336_v16, %v346_v18  ;;  %615 = vrcp.f32 %v371_v19  ;;  %51 = vrot.lane.b32.xlu1 %v792_v52, %s625_s13  ;;  %49 = vrot.lane.b32.xlu0 %v796_v53, %s625_s13  ;;  %v65_v10 = vsub.f32 %v63_v62, %v792_v52  ;;  %v563_v7 = vld [vmem:[%s937_s2 + $0x18] sm:$0xff]  ;;  %v562_v18 = vld [vmem:[%s937_s2 + $0x10] sm:$0xff] }
 0x191   :  { %617 = vrcp.f32 %v370_v20  ;;  %v64_v11 = vsub.f32 %v62_v6, %v796_v53  ;;  %v69_v19 = vmul.f32 0.00390625, %v67_v14  ;;  %v68_v20 = vmul.f32 0.00390625, %v66_v15 }
 0x192   :  { %v357_v25 = vmul.f32 2.0, %v349_v22  ;;  %v356_v28 = vmul.f32 2.0, %v348_v23  ;;  %v93_v16 = vand.u32 2147483647, %v65_v10 }
 0x193   :  { %v92_v17 = vand.u32 2147483647, %v64_v11 }
 0x194   :  { %v359_v0 = vadd.f32 0.0009, %v357_v25  ;;  %v358_v29 = vadd.f32 0.0009, %v356_v28  ;;  %76 = vrot.lane.b32.xlu1 %v25_v41, %s625_s13  ;;  %74 = vrot.lane.b32.xlu0 %v24_v42, %s625_s13  ;;  %v95_v22 = vmul.f32 %v563_v7, %v93_v16 }
 0x195   :  { %v94_v23 = vmul.f32 %v562_v18, %v92_v17 }
 0x196   :  { %v361_v31 = vmul.f32 %v359_v0, %v355_v30  ;;  %v360_v9 = vmul.f32 %v358_v29, %v354_v8 }
 0x19a   :  { %v616_v34 = vpop.eup %615 }
 0x19b   :  { %v618_v63 = vpop.eup %617  ;;  %v375_v36 = vmul.f32 %v616_v34, %v361_v31 }
 0x19c   :  { %v373_v37 = vmul.f32 %v618_v63, %v360_v9 }
 0x19d   :  { %v377_v38 = vmul.f32 %v565_v2, %v375_v36 }
 0x19e   :  { %v376_v39 = vmul.f32 %v564_v35, %v373_v37 }
 0x1a0   :  { %v596_v40 = vpack.c.bf16 %v377_v38, %v376_v39 }
 0x1a2   :  { %597 = vmatpush3.bf16.msra.mxu0 %v596_v40 }
 0x1a5   :  { %582 = vmatmul.mubr.msk.f32.vlgmr.msra.gmra.mrb[0].mxu0 %vm379_vm4, %v378_v43  ;;  %v546_v43 = vand.u32 127, %v59_v13 }
 0x1a7   :  { %vm548_vm8 = vcmp.eq.s32.totalorder %v546_v43, 0  ;;  %vm552_vm9 = vcmp.eq.s32.totalorder %v546_v43, 1 }
 0x1a8   :  { %vm549_vm10 = vmand %vm547_vm7, %vm548_vm8 }
 0x1a9   :  { %vm553_vm11 = vmand %vm547_vm7, %vm552_vm9 }
 0x1fe   :  { %v44_v44 = vpop.permute.xlu1 %43  ;;  %v42_v45 = vpop.permute.xlu0 %41 }
 0x1ff   :  { %v46_v46 = vsel %vm34_vm0, %v44_v44, %v792_v52  ;;  %v45_v47 = vsel %vm34_vm0, %v42_v45, %v796_v53 }
 0x202   :  { %v52_v4 = vpop.permute.xlu1 %51  ;;  %v50_v48 = vpop.permute.xlu0 %49 }
 0x203   :  { %v56_v49 = vsub.f32 %v46_v46, %v52_v4  ;;  %v55_v50 = vsub.f32 %v45_v47, %v50_v48 }
 0x205   :  { %v71_v5 = vand.u32 2147483647, %v56_v49  ;;  %v70_v51 = vand.u32 2147483647, %v55_v50 }
 0x206   :  { %v77_v54 = vpop.permute.xlu1 %76  ;;  %v75_v55 = vpop.permute.xlu0 %74 }
 0x207   :  { %v81_v56 = vmul.f32 %v77_v54, %v71_v5  ;;  %v80_v57 = vmul.f32 %v75_v55, %v70_v51 }
 0x209   :  { %86 = vrot.lane.b32.xlu1 %v81_v56, %s621_s1  ;;  %84 = vrot.lane.b32.xlu0 %v80_v57, %s621_s1 }
 0x278   :  { %v449_v58 = vpop.f32.mrb[0].mxu0 }
 0x279   :  { %v583_v59 = vpop.f32.mrb[1].mxu0  ;;  %593 = vmatmul.mubr.msk.f32.vlgmr.msra.gmra.mrb[0].mxu1 %vm98_vm5, %v449_v58 }
 0x27b   :  { %v87_v24 = vpop.permute.xlu1 %86  ;;  %v85_v25 = vpop.permute.xlu0 %84 }
 0x27c   :  { %v91_v26 = vadd.f32 %v87_v24, %v69_v19  ;;  %v90_v52 = vadd.f32 %v85_v25, %v68_v20 }
 0x27e   :  { %v97_v28 = vadd.f32 %v95_v22, %v91_v26  ;;  %v96_v53 = vadd.f32 %v94_v23, %v90_v52 }
 0x280   :  { %v99_v1 = vsel %vm98_vm5, %v96_v53, 0.0  ;;  %v100_v3 = vsel %vm98_vm5, %v97_v28, 0.0 }
 0x281   :  { %v101_v0 = vadd.f32 %v100_v3, %v99_v1 }
 0x283   :  { %102 = vadd.xlane.f32.xlu0 %v101_v0 }
 0x310   :  { %v103_v33 = vpop.xlane.xlu0 %102 }
 0x311   :  { %v104_v2 = vrot.slane %v103_v33, 4 }
 0x313   :  { %v105_v9 = vadd.f32 %v104_v2, %v103_v33 }
 0x315   :  { %v106_v27 = vrot.slane %v105_v9, 2 }
 0x317   :  { %v107_v12 = vadd.f32 %v106_v27, %v105_v9 }
 0x319   :  { %v108_v63 = vrot.slane %v107_v12, 1 }
 0x31b   :  { %v109_v35 = vadd.f32 %v108_v63, %v107_v12 }
 0x31d   :  { %604 = vpush %v109_v35 }
 0x34c   :  { %v526_v29 = vpop.f32.mrb[0].mxu1 }
 0x34d   :  { %v530_v30 = vsub.f32 1.0, %v526_v29  ;;  %v594_v8 = vpop.f32.mrb[1].mxu1 }
 0x34e   :  { %s605_s2 = spop %604 }
 0x34f   :  { %v531_v31 = vmax.f32 %v530_v30, 0.0  ;;  %v550_v44 = vstv %s605_s2 }
 0x350   :  { %v551_v46 = vsel %vm549_vm10, %v550_v44, 0.0 }
 0x351   :  { %v532_v32 = vmin.f32 %v531_v31, 1.0 }
 0x353   :  { %v534_v34 = vsel %vm533_vm6, %v532_v32, 0.0 }
 0x354   :  { %535 = vadd.xlane.f32.xlu1 %v534_v34 }
 0x3e1   :  { %v536_v36 = vpop.xlane.xlu1 %535 }
 0x3e2   :  { %v537_v37 = vrot.slane %v536_v36, 4 }
 0x3e4   :  { %v538_v38 = vadd.f32 %v537_v37, %v536_v36 }
 0x3e6   :  { %v539_v39 = vrot.slane %v538_v38, 2 }
 0x3e8   :  { %v540_v40 = vadd.f32 %v539_v39, %v538_v38 }
 0x3ea   :  { %v541_v41 = vrot.slane %v540_v40, 1 }
 0x3ec   :  { %v542_v42 = vadd.f32 %v541_v41, %v540_v40 }
 0x3ee   :  { %606 = vpush %v542_v42 }
 0x41f   :  { %s607_s23 = spop %606 }
 0x420   :  { %s568_s24 = sadd.f32 -62.0, %s607_s23 }
 0x422   :  { %v554_v45 = vstv %s568_s24 }
 0x423   :  { %v555_v47 = vsel %vm553_vm11, %v554_v45, 0.0 }
 0x424   :  { %v556_v4 = vadd.f32 %v555_v47, %v551_v46 }
 0x426   :  { %557 = vst [vmem:[%s939_s5] sm:$0xff] %v556_v4 }

</bundles_post_ra>
